<compile_context>
chip_gen: v6e
topology: v6e:2x2x1
jax: 0.10.0
libtpu: 0.0.40
codegen_flags: <defaults>
</compile_context>

<pallas_src>
import functools

import jax
import jax.numpy as jnp
from jax.experimental import pallas as pl
from jax.experimental.pallas import tpu as pltpu


# ---------------------------------------------------------------------------
# Shared math (kernels + XLA fallback).
# ---------------------------------------------------------------------------
def _losses_from_logits(logits, *, beta, label_smoothing, ipo):
    """Per-example DPO/IPO loss. beta/label_smoothing/ipo are Python constants,
    so all branches resolve at trace time."""
    if ipo:
        return (logits - 1.0 / (2.0 * beta)) ** 2
    z = beta * logits
    # -logsigmoid(z)(1-ls) - logsigmoid(-z)(ls)
    #   = (1-ls)*softplus(-z) + ls*softplus(z)
    #   = log1p(exp(-|z|)) + (1-ls)*relu(-z) + ls*relu(z)
    # -> both log-sigmoid terms share ONE exp and ONE log1p (EUP slot).
    t = jnp.log1p(jnp.exp(-jnp.abs(z)))
    if label_smoothing == 0.0:
        return t + jnp.maximum(-z, 0.0)
    return (t
            + (1.0 - label_smoothing) * jnp.maximum(-z, 0.0)
            + label_smoothing * jnp.maximum(z, 0.0))


def _pack_2d(B):
    """Sublane/lane-dense 2-D view of a length-B vector."""
    if B % 128 == 0:
        return (B // 128, 128)
    if B % 8 == 0:
        return (8, B // 8)
    return (1, B)          # fallback for tiny / odd B


def _choose_tiling(B, block_rows):
    """Tile rows (multiple of 8), grid steps (>= 4 when B allows), padded B."""
    lane = 128
    cap = max(8, (int(block_rows) // 8) * 8)
    tr = B // (4 * lane)                  # aim for at least 4 grid steps
    tr = max(8, min(cap, (tr // 8) * 8))
    tile = tr * lane
    nt = -(-B // tile)                    # ceil
    return tr, nt, nt * tile


# ---------------------------------------------------------------------------
# Fused tiled kernel (pipelined over the batch, losses persistent in VMEM).
# ---------------------------------------------------------------------------
def _kldpo_fused_kernel(pc_ref, pr_ref, rc_ref, rr_ref,
                        loss_ref, cr_ref, rj_ref,
                        losses_vmem, lsum_ref,
                        *, beta, label_smoothing, ipo, inv_tau, inv_n,
                        tr, nt, b_real, b_pad):
    i = pl.program_id(0)

    @pl.when(i == 0)
    def _init():
        lsum_ref[...] = jnp.zeros_like(lsum_ref)

    pc = pc_ref[...].astype(jnp.float32)
    pr = pr_ref[...].astype(jnp.float32)
    rc = rc_ref[...].astype(jnp.float32)
    rr = rr_ref[...].astype(jnp.float32)

    # Rewards first: their writeback DMA overlaps the reductions below and the
    # four f32 input temporaries go dead early.
    cr_ref[...] = (beta * (pc - rc)).astype(cr_ref.dtype)
    rj_ref[...] = (beta * (pr - rr)).astype(rj_ref.dtype)

    logits = (pc - pr) - (rc - rr)
    losses = _losses_from_logits(logits, beta=beta,
                                 label_smoothing=label_smoothing, ipo=ipo)

    if b_pad != b_real:                       # trace-time constant
        row = jax.lax.broadcasted_iota(jnp.int32, (tr, 128), 0)
        col = jax.lax.broadcasted_iota(jnp.int32, (tr, 128), 1)
        idx = (i * tr + row) * 128 + col
        losses = jnp.where(idx < b_real, losses, 0.0)

    start = pl.multiple_of(i * tr, 8)
    losses_vmem[pl.ds(start, tr), :] = losses
    lsum_ref[...] = lsum_ref[...] + jnp.sum(losses, keepdims=True)

    @pl.when(i == nt - 1)
    def _finalize():
        # all_gather with world_size == 1 -> gathered mean == local mean.
        mean = lsum_ref[...] * inv_n          # (1, 1)

        def body(t, acc):
            s = pl.multiple_of(t * tr, 8)
            blk = losses_vmem[pl.ds(s, tr), :]
            zt = blk - mean
            if inv_tau != 1.0:                # trace-time constant
                zt = zt * inv_tau
            ps = jnp.minimum(jnp.exp(zt), 10.0)
            return acc + jnp.sum(ps * blk, keepdims=True)

        acc = jax.lax.fori_loop(0, nt, body, jnp.zeros((1, 1), jnp.float32))
        loss_ref[...] = acc * inv_n


def _kldpo_fused_tiled(pc, pr, rc, rr, *, beta, label_smoothing, ipo, inv_tau,
                       tr, nt, b_pad):
    B = int(pc.shape[0])
    out_dtype = pc.dtype
    if b_pad != B:
        pad = b_pad - B
        pc, pr, rc, rr = (jnp.pad(a, (0, pad)) for a in (pc, pr, rc, rr))
    R = b_pad // 128
    shape2d = (R, 128)
    pc2, pr2, rc2, rr2 = (a.reshape(shape2d) for a in (pc, pr, rc, rr))

    tile_map = lambda i: (i, 0)
    tile_f32 = tr * 128 * 4
    vmem_need = (b_pad * 4                # persistent losses scratch
                 + 2 * 6 * tile_f32       # double-buffered tile streams
                 + 6 * tile_f32           # in-kernel f32 temporaries
                 + (2 << 20))             # slack
    vmem_limit = int(min(max(vmem_need, 32 << 20), 48 << 20))

    kernel = functools.partial(
        _kldpo_fused_kernel, beta=beta, label_smoothing=label_smoothing,
        ipo=ipo, inv_tau=inv_tau, inv_n=1.0 / B, tr=tr, nt=nt,
        b_real=B, b_pad=b_pad)

    loss, cr2, rj2 = pl.pallas_call(
        kernel,
        grid=(nt,),
        out_shape=(jax.ShapeDtypeStruct((1, 1), jnp.float32),
                   jax.ShapeDtypeStruct(shape2d, out_dtype),
                   jax.ShapeDtypeStruct(shape2d, out_dtype)),
        in_specs=[pl.BlockSpec((tr, 128), tile_map)] * 4,
        out_specs=(pl.BlockSpec((1, 1), lambda i: (0, 0)),
                   pl.BlockSpec((tr, 128), tile_map),
                   pl.BlockSpec((tr, 128), tile_map)),
        scratch_shapes=[pltpu.VMEM((R, 128), jnp.float32),   # losses (persist)
                        pltpu.VMEM((1, 1), jnp.float32)],    # running loss sum
        compiler_params=pltpu.CompilerParams(
            dimension_semantics=("arbitrary",),
            vmem_limit_bytes=vmem_limit),
    )(pc2, pr2, rc2, rr2)

    return loss[0, 0], cr2.reshape(b_pad)[:B], rj2.reshape(b_pad)[:B]


# ---------------------------------------------------------------------------
# Gridless single-block kernel (small batches: everything resident in VMEM).
# ---------------------------------------------------------------------------
def _kldpo_gridless_kernel(pc_ref, pr_ref, rc_ref, rr_ref,
                           loss_ref, cr_ref, rj_ref,
                           *, beta, label_smoothing, ipo, inv_tau, inv_n):
    pc = pc_ref[...].astype(jnp.float32)
    pr = pr_ref[...].astype(jnp.float32)
    rc = rc_ref[...].astype(jnp.float32)
    rr = rr_ref[...].astype(jnp.float32)

    # Rewards first (writeback overlaps the reduction chain below).
    cr_ref[...] = (beta * (pc - rc)).astype(cr_ref.dtype)
    rj_ref[...] = (beta * (pr - rr)).astype(rj_ref.dtype)

    logits = (pc - pr) - (rc - rr)
    losses = _losses_from_logits(logits, beta=beta,
                                 label_smoothing=label_smoothing, ipo=ipo)

    # all_gather with world_size == 1 -> gathered mean == local mean.
    mean = jnp.sum(losses, keepdims=True) * inv_n          # (1, 1)
    zt = losses - mean
    if inv_tau != 1.0:                                     # trace-time constant
        zt = zt * inv_tau
    ps = jnp.minimum(jnp.exp(zt), 10.0)
    loss_ref[...] = jnp.sum(ps * losses, keepdims=True) * inv_n


def _kldpo_gridless(pc, pr, rc, rr, *, beta, label_smoothing, ipo, inv_tau):
    B = int(pc.shape[0])
    shape2d = _pack_2d(B)
    pc2, pr2, rc2, rr2 = (a.reshape(shape2d) for a in (pc, pr, rc, rr))
    out_dtype = pc.dtype

    loss, cr2, rj2 = pl.pallas_call(
        functools.partial(_kldpo_gridless_kernel, beta=beta,
                          label_smoothing=label_smoothing, ipo=ipo,
                          inv_tau=inv_tau, inv_n=1.0 / B),
        out_shape=(jax.ShapeDtypeStruct((1, 1), jnp.float32),
                   jax.ShapeDtypeStruct(shape2d, out_dtype),
                   jax.ShapeDtypeStruct(shape2d, out_dtype)),
    )(pc2, pr2, rc2, rr2)
    return loss[0, 0], cr2.reshape(B), rj2.reshape(B)


# ---------------------------------------------------------------------------
# Pure-XLA fallback (tiny batches, or enormous batches whose losses exceed
# the VMEM scratch budget).
# ---------------------------------------------------------------------------
def _kldpo_xla(pc, pr, rc, rr, *, beta, label_smoothing, ipo, inv_tau):
    out_dtype = pc.dtype
    pcf, prf, rcf, rrf = (a.astype(jnp.float32) for a in (pc, pr, rc, rr))
    logits = (pcf - prf) - (rcf - rrf)
    losses = _losses_from_logits(logits, beta=beta,
                                 label_smoothing=label_smoothing, ipo=ipo)
    zt = losses - jnp.mean(losses)
    if inv_tau != 1.0:
        zt = zt * inv_tau
    ps = jnp.minimum(jnp.exp(zt), 10.0)
    loss = jnp.mean(ps * losses)
    cr = (beta * (pcf - rcf)).astype(out_dtype)
    rj = (beta * (prf - rrf)).astype(out_dtype)
    return loss, cr, rj


# ---------------------------------------------------------------------------
# Public entry point.
# ---------------------------------------------------------------------------
def kldpo_loss(policy_chosen_logps, policy_rejected_logps,
               reference_chosen_logps, reference_rejected_logps,
               *, beta, label_smoothing=0.0, ipo=False, kldpo_tau=1.0,
               min_pallas_batch=2048, min_tiled_batch=8192, block_rows=512,
               max_scratch_bytes=24 << 20):
    """Returns (loss scalar, chosen_rewards (B,), rejected_rewards (B,))."""
    B = int(policy_chosen_logps.shape[0])
    beta = float(beta)
    label_smoothing = float(label_smoothing)
    ipo = bool(ipo)
    inv_tau = 1.0 / float(kldpo_tau)

    args = (policy_chosen_logps, policy_rejected_logps,
            reference_chosen_logps, reference_rejected_logps)
    common = dict(beta=beta, label_smoothing=label_smoothing, ipo=ipo,
                  inv_tau=inv_tau)

    # Tiny batches: fixed launch overhead dominates -> plain XLA fusion wins.
    if B < min_pallas_batch:
        return _kldpo_xla(*args, **common)

    # Tiled fused path: pipelined (tr, 128) tiles, losses held in VMEM scratch.
    use_tiled = B >= max(int(min_tiled_batch), 4096)
    if not use_tiled and B * 16 > (8 << 20):
        # Too big for an unpipelined single block (notably v7x 64 MiB VMEM).
        use_tiled = True
    if use_tiled:
        tr, nt, b_pad = _choose_tiling(B, block_rows)
        if b_pad * 4 <= int(max_scratch_bytes):
            return _kldpo_fused_tiled(*args, **common, tr=tr, nt=nt,
                                      b_pad=b_pad)
        # TODO(synk): batches whose f32 losses exceed the VMEM scratch budget
        # (> ~6M examples) would need the HBM-staged two-pass kernel; fall back
        # to XLA there.
        return _kldpo_xla(*args, **common)

    # Small/mid batches: one VMEM-resident block, single invocation.
    return _kldpo_gridless(*args, **common)


# ---------------------------------------------------------------------------
# Independent reference + self-test.
# ---------------------------------------------------------------------------
def _reference_jax(pc, pr, rc, rr, *, beta, label_smoothing=0.0, ipo=False,
                   kldpo_tau=1.0):
    logits = (pc - pr) - (rc - rr)
    if ipo:
        losses = (logits - 1.0 / (2.0 * beta)) ** 2
    else:
        losses = (-jax.nn.log_sigmoid(beta * logits) * (1.0 - label_smoothing)
                  - jax.nn.log_sigmoid(-beta * logits) * label_smoothing)
    ps = jnp.minimum(jnp.exp((losses - losses.mean()) / kldpo_tau), 10.0)
    loss = (ps * losses).mean()
    return loss, beta * (pc - rc), beta * (pr - rr)


if __name__ == "__main__":
    root = jax.random.PRNGKey(0)

    def make_inputs(key, B):
        ks = jax.random.split(key, 4)
        # Log-probs are negative; small deterministic synthetic values.
        return tuple(-jnp.abs(jax.random.normal(k, (B,), jnp.float32))
                     for k in ks)

    cases = [
        # (name, B, hyper-params, routing overrides)
        ("xla_fallback_tiny", 8,
         dict(beta=0.1, label_smoothing=0.0, ipo=False, kldpo_tau=1.0), {}),
        ("pallas_gridless", 2048,
         dict(beta=0.25, label_smoothing=0.1, ipo=False, kldpo_tau=0.7), {}),
        ("pallas_gridless_ipo", 3072,
         dict(beta=0.1, label_smoothing=0.0, ipo=True, kldpo_tau=1.0), {}),
        ("pallas_fused_tiled", 8192,
         dict(beta=0.1, label_smoothing=0.0, ipo=False, kldpo_tau=1.0), {}),
        ("pallas_fused_tiled_padded", 5000,
         dict(beta=0.1, label_smoothing=0.0, ipo=False, kldpo_tau=0.5),
         dict(min_tiled_batch=4096)),
    ]

    key = root
    for name, B, hp, overrides in cases:
        key, sub = jax.random.split(key)
        pc, pr, rc, rr = make_inputs(sub, B)

        loss, cr, rj = kldpo_loss(pc, pr, rc, rr, **hp, **overrides)
        jax.block_until_ready((loss, cr, rj))

        ref_loss, ref_cr, ref_rj = _reference_jax(pc, pr, rc, rr, **hp)
        assert jnp.allclose(loss, ref_loss, rtol=2e-4, atol=1e-5), (
            name, float(loss), float(ref_loss))
        assert jnp.allclose(cr, ref_cr, rtol=1e-5, atol=1e-5), name
        assert jnp.allclose(rj, ref_rj, rtol=1e-5, atol=1e-5), name

    print("KERNEL_OK")
</pallas_src>

<mosaic_0001>
module attributes {stable_mosaic.version = 11 : i64} {
  func.func @_kldpo_gridless_kernel(%arg0: memref<16x128xf32, #tpu.memory_space<vmem>>, %arg1: memref<16x128xf32, #tpu.memory_space<vmem>>, %arg2: memref<16x128xf32, #tpu.memory_space<vmem>>, %arg3: memref<16x128xf32, #tpu.memory_space<vmem>>, %arg4: memref<1x1xf32, #tpu.memory_space<vmem>>, %arg5: memref<16x128xf32, #tpu.memory_space<vmem>>, %arg6: memref<16x128xf32, #tpu.memory_space<vmem>>) attributes {dimension_semantics = [], scalar_prefetch = 0 : i64, scratch_operands = 0 : i64, tpu.core_type = #tpu.core_type<tc>} {
    %c0 = arith.constant 0 : index
    %c0_0 = arith.constant 0 : index
    %0 = vector.load %arg0[%c0, %c0_0] : memref<16x128xf32, #tpu.memory_space<vmem>>, vector<16x128xf32>
    %c0_1 = arith.constant 0 : index
    %c0_2 = arith.constant 0 : index
    %1 = vector.load %arg1[%c0_1, %c0_2] : memref<16x128xf32, #tpu.memory_space<vmem>>, vector<16x128xf32>
    %c0_3 = arith.constant 0 : index
    %c0_4 = arith.constant 0 : index
    %2 = vector.load %arg2[%c0_3, %c0_4] : memref<16x128xf32, #tpu.memory_space<vmem>>, vector<16x128xf32>
    %c0_5 = arith.constant 0 : index
    %c0_6 = arith.constant 0 : index
    %3 = vector.load %arg3[%c0_5, %c0_6] : memref<16x128xf32, #tpu.memory_space<vmem>>, vector<16x128xf32>
    %4 = arith.subf %0, %2 : vector<16x128xf32>
    %cst = arith.constant 2.500000e-01 : f32
    %5 = vector.broadcast %cst : f32 to vector<16x128xf32>
    %6 = arith.mulf %5, %4 : vector<16x128xf32>
    %c0_7 = arith.constant 0 : index
    %c0_8 = arith.constant 0 : index
    %7 = vector.load %arg5[%c0_7, %c0_8] : memref<16x128xf32, #tpu.memory_space<vmem>>, vector<16x128xf32>
    tpu.vector_store %arg5[%c0_7, %c0_8], %6 {strides = array<i32>} : memref<16x128xf32, #tpu.memory_space<vmem>>, vector<16x128xf32>,
    %8 = arith.subf %1, %3 : vector<16x128xf32>
    %cst_9 = arith.constant 2.500000e-01 : f32
    %9 = vector.broadcast %cst_9 : f32 to vector<16x128xf32>
    %10 = arith.mulf %9, %8 : vector<16x128xf32>
    %c0_10 = arith.constant 0 : index
    %c0_11 = arith.constant 0 : index
    %11 = vector.load %arg6[%c0_10, %c0_11] : memref<16x128xf32, #tpu.memory_space<vmem>>, vector<16x128xf32>
    tpu.vector_store %arg6[%c0_10, %c0_11], %10 {strides = array<i32>} : memref<16x128xf32, #tpu.memory_space<vmem>>, vector<16x128xf32>,
    %12 = arith.subf %0, %1 : vector<16x128xf32>
    %13 = arith.subf %2, %3 : vector<16x128xf32>
    %14 = arith.subf %12, %13 : vector<16x128xf32>
    %cst_12 = arith.constant 2.500000e-01 : f32
    %15 = vector.broadcast %cst_12 : f32 to vector<16x128xf32>
    %16 = arith.mulf %15, %14 : vector<16x128xf32>
    %17 = math.absf %16 : vector<16x128xf32>
    %cst_13 = arith.constant 0.000000e+00 : f32
    %18 = vector.broadcast %cst_13 : f32 to vector<16x128xf32>
    %19 = arith.subf %18, %17 : vector<16x128xf32>
    %20 = math.exp %19 : vector<16x128xf32>
    %21 = math.log1p %20 : vector<16x128xf32>
    %cst_14 = arith.constant 0.000000e+00 : f32
    %22 = vector.broadcast %cst_14 : f32 to vector<16x128xf32>
    %23 = arith.subf %22, %16 : vector<16x128xf32>
    %cst_15 = arith.constant 0.000000e+00 : f32
    %24 = vector.broadcast %cst_15 : f32 to vector<16x128xf32>
    %25 = arith.maximumf %23, %24 : vector<16x128xf32>
    %cst_16 = arith.constant 0.899999976 : f32
    %26 = vector.broadcast %cst_16 : f32 to vector<16x128xf32>
    %27 = arith.mulf %26, %25 : vector<16x128xf32>
    %28 = arith.addf %21, %27 : vector<16x128xf32>
    %cst_17 = arith.constant 0.000000e+00 : f32
    %29 = vector.broadcast %cst_17 : f32 to vector<16x128xf32>
    %30 = arith.maximumf %16, %29 : vector<16x128xf32>
    %cst_18 = arith.constant 1.000000e-01 : f32
    %31 = vector.broadcast %cst_18 : f32 to vector<16x128xf32>
    %32 = arith.mulf %31, %30 : vector<16x128xf32>
    %33 = arith.addf %28, %32 : vector<16x128xf32>
    %34 = vector.shape_cast %33 : vector<16x128xf32> to vector<1x16x128xf32>
    %cst_19 = arith.constant dense<0.000000e+00> : vector<1xf32>
    %35 = vector.multi_reduction <add>, %34, %cst_19 [1, 2] : vector<1x16x128xf32> to vector<1xf32>
    %36 = vector.shape_cast %35 : vector<1xf32> to vector<1x1x1xf32>
    %37 = vector.extract %36[0, 0, 0] : f32 from vector<1x1x1xf32>
    %38 = vector.broadcast %37 : f32 to vector<1x1xf32>
    %cst_20 = arith.constant 4.8828125E-4 : f32
    %39 = vector.broadcast %cst_20 : f32 to vector<1x1xf32>
    %40 = arith.mulf %38, %39 : vector<1x1xf32>
    %41 = vector.broadcast %40 : vector<1x1xf32> to vector<16x128xf32>
    %42 = arith.subf %33, %41 : vector<16x128xf32>
    %cst_21 = arith.constant 1.42857146 : f32
    %43 = vector.broadcast %cst_21 : f32 to vector<16x128xf32>
    %44 = arith.mulf %42, %43 : vector<16x128xf32>
    %45 = math.exp %44 : vector<16x128xf32>
    %cst_22 = arith.constant 1.000000e+01 : f32
    %46 = vector.broadcast %cst_22 : f32 to vector<16x128xf32>
    %47 = arith.minimumf %45, %46 : vector<16x128xf32>
    %48 = arith.mulf %47, %33 : vector<16x128xf32>
    %49 = vector.shape_cast %48 : vector<16x128xf32> to vector<1x16x128xf32>
    %cst_23 = arith.constant dense<0.000000e+00> : vector<1xf32>
    %50 = vector.multi_reduction <add>, %49, %cst_23 [1, 2] : vector<1x16x128xf32> to vector<1xf32>
    %51 = vector.shape_cast %50 : vector<1xf32> to vector<1x1x1xf32>
    %52 = vector.extract %51[0, 0, 0] : f32 from vector<1x1x1xf32>
    %53 = vector.broadcast %52 : f32 to vector<1x1xf32>
    %cst_24 = arith.constant 4.8828125E-4 : f32
    %54 = vector.broadcast %cst_24 : f32 to vector<1x1xf32>
    %55 = arith.mulf %53, %54 : vector<1x1xf32>
    %c0_25 = arith.constant 0 : index
    %c0_26 = arith.constant 0 : index
    %56 = vector.load %arg4[%c0_25, %c0_26] : memref<1x1xf32, #tpu.memory_space<vmem>>, vector<1x1xf32>
    tpu.vector_store %arg4[%c0_25, %c0_26], %55 {strides = array<i32>} : memref<1x1xf32, #tpu.memory_space<vmem>>, vector<1x1xf32>,
    return
  }
}

</mosaic_0001>

<bundles_post_ra>
// kernel: tpu_custom_call.1
= control target key start
LH: loop header
LB: loop body
LE: loop exit
PB: predicated region body
PF: predicated region fallthrough
CT: control target
= control target key end

     0   :  { %12 = vsyncpa [#allocation3], 0  ;;  %s521_s0 = inlined_call_operand.hbm [shape: f32[16,128], index: 0, kind: input, shape index: {}]   ;;  %s522_s1 = inlined_call_operand.hbm [shape: f32[16,128], index: 1, kind: input, shape index: {}]   ;;  %s523_s2 = inlined_call_operand.hbm [shape: f32[16,128], index: 2, kind: input, shape index: {}]   ;;  %s524_s3 = inlined_call_operand.hbm [shape: f32[16,128], index: 3, kind: input, shape index: {}]   ;;  %s525_s4 = inlined_call_operand.hbm [shape: f32[1,1], index: 4, kind: output, shape index: {0}]   ;;  %s526_s5 = inlined_call_operand.hbm [shape: f32[16,128], index: 5, kind: output, shape index: {1}]   ;;  %s527_s6 = inlined_call_operand.hbm [shape: f32[16,128], index: 6, kind: output, shape index: {2}]  }
   0x1   :  { %13 = vsyncpa [#allocation6], 0 }
   0x2   :  { %14 = vsyncpa [#allocation9], 0 }
   0x3   :  { %15 = vsyncpa [#allocation4], 0 }
   0x4   :  { %16 = vsyncpa [#allocation12], 0  ;;  %s406_s21 = smov [#allocation5]   ;;  %s407_s23 = smov [#allocation2]  }
   0x5   :  { %s34_s22 = sshll.u32 %s406_s21, 4  ;;  %s22_s24 = sshll.u32 %s407_s23, 4  ;;  %s35_s22 = int_to_ptr.vmem [resolvable:$true] %s34_s22  ;;  %s23_s24 = int_to_ptr.vmem [resolvable:$true] %s22_s24 }
   0x6   :  { %s264_s25 = scalar_lea.vmem %s35_s22, 256  ;;  %p269_p1 = scmp.lt.s32.totalorder %s35_s22, %s35_s22 }
   0x7   :  { %p265_p0 = scmp.ne.s32.totalorder %s35_s22, %s264_s25  ;;  %p270_p2 = scmp.lt.s32.totalorder %s264_s25, %s264_s25 }
   0x9   :  { %p271_p3 = por %p270_p2, %p269_p1 }
   0xb   :  { %p272_p4 = pnand %p271_p3, %p265_p0 }
   0xd   :  { %275 = shalt.err (!%p272_p4)
}
   0xe   :  { %s408_s26 = smov 128   ;;  %s409_s27 = smov 8  }
   0xf   :  { %40 = dma.hbm_to_vmem [thread:$0]  %s522_s1, 256, %s35_s22, [#allocation6], %s408_s26, %s408_s26, %s409_s27  }
  0x10   :  { %s284_s30 = scalar_lea.vmem %s23_s24, 256  ;;  %p289_p6 = scmp.lt.s32.totalorder %s23_s24, %s23_s24 }
  0x11   :  { %p285_p5 = scmp.ne.s32.totalorder %s23_s24, %s284_s30  ;;  %p290_p7 = scmp.lt.s32.totalorder %s284_s30, %s284_s30 }
  0x13   :  { %p291_p8 = por %p290_p7, %p289_p6 }
  0x15   :  { %p292_p9 = pnand %p291_p8, %p285_p5 }
  0x17   :  { %295 = shalt.err (!%p292_p9)
}
  0x18   :  { %28 = dma.hbm_to_vmem [thread:$0]  %s521_s0, 256, %s23_s24, [#allocation3], %s408_s26, %s408_s26, %s409_s27  }
  0x19   :  { %s410_s9 = smov [#allocation7]   ;;  %s411_s11 = smov [#allocation8]  }
  0x1a   :  { %s46_s10 = sshll.u32 %s410_s9, 4  ;;  %s58_s12 = sshll.u32 %s411_s11, 4  ;;  %s47_s10 = int_to_ptr.vmem [resolvable:$true] %s46_s10  ;;  %s59_s12 = int_to_ptr.vmem [resolvable:$true] %s58_s12 }
  0x1b   :  { %s304_s1 = scalar_lea.vmem %s47_s10, 256  ;;  %p309_p11 = scmp.lt.s32.totalorder %s47_s10, %s47_s10 }
  0x1c   :  { %p305_p10 = scmp.ne.s32.totalorder %s47_s10, %s304_s1  ;;  %p310_p12 = scmp.lt.s32.totalorder %s304_s1, %s304_s1 }
  0x1e   :  { %p311_p13 = por %p310_p12, %p309_p11 }
  0x20   :  { %p312_p0 = pnand %p311_p13, %p305_p10 }
  0x22   :  { %315 = shalt.err (!%p312_p0)
}
  0x23   :  { %52 = dma.hbm_to_vmem [thread:$0]  %s523_s2, 256, %s47_s10, [#allocation6], %s408_s26, %s408_s26, %s409_s27  }
  0x24   :  { %s324_s0 = scalar_lea.vmem %s59_s12, 256  ;;  %p329_p2 = scmp.lt.s32.totalorder %s59_s12, %s59_s12 }
  0x25   :  { %p325_p1 = scmp.ne.s32.totalorder %s59_s12, %s324_s0  ;;  %p330_p3 = scmp.lt.s32.totalorder %s324_s0, %s324_s0 }
  0x27   :  { %p331_p4 = por %p330_p3, %p329_p2 }
  0x29   :  { %p332_p5 = pnand %p331_p4, %p325_p1 }
  0x2b   :  { %335 = shalt.err (!%p332_p5)
}
  0x2c   :  { %64 = dma.hbm_to_vmem [thread:$0]  %s524_s3, 256, %s59_s12, [#allocation9], %s408_s26, %s408_s26, %s409_s27  }
  0x2d   :  { %396 = dma.done.wait [#allocation3], 256  }
  0x2e   :  { %397 = vsyncadd [#allocation3], 4294967040 }
  0x2f   :  { %398 = dma.done.wait [#allocation6], 512  }
  0x30   :  { %399 = vsyncadd [#allocation6], 4294966784 }
  0x31   :  { %400 = dma.done.wait [#allocation9], 256  }
  0x32   :  { %401 = vsyncadd [#allocation9], 4294967040  ;;  %v474_v0 = vld [vmem:[#allocation2] sm:$0xff]  ;;  %v476_v1 = vld [vmem:[#allocation2 + $0x8] sm:$0xff]  ;;  %s412_s3 = smov [#allocation11]  }
  0x33   :  { %v478_v2 = vld [vmem:[#allocation5] sm:$0xff]  ;;  %v480_v3 = vld [vmem:[#allocation5 + $0x8] sm:$0xff]  ;;  %v482_v4 = vld [vmem:[#allocation7] sm:$0xff]  ;;  %s198_s17 = sshll.u32 %s412_s3, 4  ;;  %s199_s17 = int_to_ptr.vmem [resolvable:$true] %s198_s17 }
  0x34   :  { %v484_v5 = vld [vmem:[#allocation7 + $0x8] sm:$0xff]  ;;  %v97_v6 = vsub.f32 %v474_v0, %v478_v2  ;;  %v488_v7 = vld [vmem:[#allocation8] sm:$0xff]  ;;  %v490_v8 = vld [vmem:[#allocation8 + $0x8] sm:$0xff]  ;;  %v98_v9 = vsub.f32 %v476_v1, %v480_v3  ;;  %s336_s18 = scalar_lea.vmem %s199_s17, 256  ;;  %p341_p7 = scmp.lt.s32.totalorder %s199_s17, %s199_s17 }
  0x35   :  { %v99_v10 = vsub.f32 %v482_v4, %v488_v7  ;;  %v100_v11 = vsub.f32 %v484_v5, %v490_v8  ;;  %p337_p6 = scmp.ne.s32.totalorder %s199_s17, %s336_s18  ;;  %p342_p8 = scmp.lt.s32.totalorder %s336_s18, %s336_s18 }
  0x37   :  { %v101_v12 = vsub.f32 %v97_v6, %v99_v10  ;;  %v102_v13 = vsub.f32 %v98_v9, %v100_v11  ;;  %p343_p9 = por %p342_p8, %p341_p7 }
  0x39   :  { %v103_v14 = vmul.f32 0.25, %v101_v12  ;;  %v104_v15 = vmul.f32 0.25, %v102_v13  ;;  %p344_p10 = pnand %p343_p9, %p337_p6 }
  0x3b   :  { %v105_v16 = vand.u32 2147483647, %v103_v14  ;;  %v106_v17 = vand.u32 2147483647, %v104_v15  ;;  %v131_v28 = vsub.f32 0.0, %v103_v14  ;;  %v132_v29 = vsub.f32 0.0, %v104_v15 }
  0x3c   :  { %v139_v36 = vmax.f32 %v103_v14, 0.0  ;;  %v140_v38 = vmax.f32 %v104_v15, 0.0 }
  0x3d   :  { %v107_v18 = vsub.f32 0.0, %v105_v16  ;;  %v108_v19 = vsub.f32 0.0, %v106_v17  ;;  %v133_v33 = vmax.f32 %v131_v28, 0.0  ;;  %v134_v35 = vmax.f32 %v132_v29, 0.0 }
  0x3e   :  { %v141_v46 = vmul.f32 0.1, %v139_v36  ;;  %v142_v48 = vmul.f32 0.1, %v140_v38 }
  0x3f   :  { %v109_v20 = vmul.f32 1.442695, %v107_v18  ;;  %v111_v21 = vmul.f32 1.442695, %v108_v19  ;;  %v135_v41 = vmul.f32 0.9, %v133_v33 }
  0x40   :  { %v136_v44 = vmul.f32 0.9, %v134_v35 }
  0x41   :  { %244 = vpow2.f32 %v109_v20 }
  0x42   :  { %246 = vpow2.f32 %v111_v21  ;;  %v85_v21 = vsub.f32 %v474_v0, %v482_v4 }
  0x4e   :  { %v245_v22 = vpop.eup %244 }
  0x4f   :  { %v247_v23 = vpop.eup %246  ;;  %v113_v24 = vadd.f32 1.0, %v245_v22  ;;  %v116_v26 = vmul.f32 -0.5, %v245_v22  ;;  %v119_v31 = vand.u32 2147483647, %v245_v22 }
  0x50   :  { %v122_v25 = vadd.f32 1.0, %v247_v23  ;;  %v125_v27 = vmul.f32 -0.5, %v247_v23  ;;  %v128_v34 = vand.u32 2147483647, %v247_v23 }
  0x51   :  { %248 = vlog2.f32 %v113_v24  ;;  %v117_v30 = vadd.f32 1.0, %v116_v26  ;;  %vm120_vm0 = vcmp.lt.f32.partialorder %v119_v31, 0.0004427343  ;;  %v92_v24 = vsub.f32 %v480_v3, %v490_v8 }
  0x52   :  { %250 = vlog2.f32 %v122_v25  ;;  %v126_v32 = vadd.f32 1.0, %v125_v27  ;;  %vm129_vm1 = vcmp.lt.f32.partialorder %v128_v34, 0.0004427343  ;;  %v87_v25 = vmul.f32 0.25, %v85_v21 }
  0x53   :  { %v118_v37 = vmul.f32 %v245_v22, %v117_v30  ;;  %v86_v22 = vsub.f32 %v476_v1, %v484_v5  ;;  %v94_v28 = vmul.f32 0.25, %v92_v24 }
  0x54   :  { %v127_v40 = vmul.f32 %v247_v23, %v126_v32  ;;  %v91_v23 = vsub.f32 %v478_v2, %v488_v7  ;;  %89 = vst [vmem:[#allocation11] sm:$0xff] %v87_v25 }
  0x55   :  { %v88_v26 = vmul.f32 0.25, %v86_v22 }
  0x56   :  { %v93_v27 = vmul.f32 0.25, %v91_v23 }
  0x57   :  { %90 = vst [vmem:[#allocation11 + $0x8] sm:$0xff] %v88_v26 }
  0x5e   :  { %v249_v39 = vpop.eup %248 }
  0x5f   :  { %v251_v42 = vpop.eup %250  ;;  %v115_v43 = vmul.f32 0.6931472, %v249_v39 }
  0x60   :  { %v124_v45 = vmul.f32 0.6931472, %v251_v42 }
  0x61   :  { %v121_v47 = vsel %vm120_vm0, %v118_v37, %v115_v43 }
  0x62   :  { %v130_v49 = vsel %vm129_vm1, %v127_v40, %v124_v45  ;;  %v137_v50 = vadd.f32 %v135_v41, %v121_v47 }
  0x63   :  { %v138_v51 = vadd.f32 %v136_v44, %v130_v49 }
  0x64   :  { %v143_v52 = vadd.f32 %v141_v46, %v137_v50 }
  0x65   :  { %v144_v53 = vadd.f32 %v142_v48, %v138_v51 }
  0x67   :  { %v145_v54 = vadd.f32 %v144_v53, %v143_v52 }
  0x69   :  { %146 = vadd.xlane.f32.xlu0 %v145_v54 }
  0xf2   :  { %v147_v55 = vpop.xlane.xlu0 %146 }
  0xf3   :  { %v148_v56 = vrot.slane %v147_v55, 4 }
  0xf5   :  { %v149_v57 = vadd.f32 %v148_v56, %v147_v55 }
  0xf7   :  { %v150_v58 = vrot.slane %v149_v57, 2 }
  0xf9   :  { %v151_v59 = vadd.f32 %v150_v58, %v149_v57 }
  0xfb   :  { %v152_v60 = vrot.slane %v151_v59, 1 }
  0xfd   :  { %v153_v61 = vadd.f32 %v152_v60, %v151_v59 }
  0xff   :  { %231 = vpush %v153_v61 }
 0x130   :  { %s232_s2 = spop %231 }
 0x131   :  { %v155_v62 = vstv %s232_s2 }
 0x132   :  { %v156_v63 = vmul.f32 0.00048828125, %v155_v62 }
 0x134   :  { %v157_v6 = vsub.f32 %v143_v52, %v156_v63  ;;  %v158_v9 = vsub.f32 %v144_v53, %v156_v63 }
 0x136   :  { %v159_v10 = vmul.f32 1.4285715, %v157_v6  ;;  %v160_v11 = vmul.f32 1.4285715, %v158_v9 }
 0x138   :  { %v161_v12 = vmul.f32 1.442695, %v159_v10  ;;  %v163_v13 = vmul.f32 1.442695, %v160_v11 }
 0x13a   :  { %252 = vpow2.f32 %v161_v12 }
 0x13b   :  { %254 = vpow2.f32 %v163_v13 }
 0x147   :  { %v253_v14 = vpop.eup %252 }
 0x148   :  { %v255_v15 = vpop.eup %254  ;;  %v165_v16 = vmin.f32 %v253_v14, 10.0 }
 0x149   :  { %v166_v17 = vmin.f32 %v255_v15, 10.0 }
 0x14a   :  { %v167_v18 = vmul.f32 %v165_v16, %v143_v52 }
 0x14b   :  { %v168_v19 = vmul.f32 %v166_v17, %v144_v53 }
 0x14d   :  { %v169_v20 = vadd.f32 %v168_v19, %v167_v18 }
 0x14f   :  { %170 = vadd.xlane.f32.xlu0 %v169_v20 }
 0x150   :  { %347 = shalt.err (!%p344_p10)
}
 0x151   :  { %204 = dma.vmem_to_hbm [thread:$0]  %s199_s17, 256, %s526_s5, [#allocation12], %s408_s26, %s408_s26, %s409_s27   ;;  %95 = vst [vmem:[#allocation13] sm:$0xff] %v93_v27  ;;  %96 = vst [vmem:[#allocation13 + $0x8] sm:$0xff] %v94_v28 }
 0x152   :  { %s413_s21 = smov [#allocation13]  }
 0x153   :  { %s210_s22 = sshll.u32 %s413_s21, 4  ;;  %s211_s22 = int_to_ptr.vmem [resolvable:$true] %s210_s22 }
 0x154   :  { %s356_s23 = scalar_lea.vmem %s211_s22, 256  ;;  %p361_p12 = scmp.lt.s32.totalorder %s211_s22, %s211_s22 }
 0x155   :  { %p357_p11 = scmp.ne.s32.totalorder %s211_s22, %s356_s23  ;;  %p362_p13 = scmp.lt.s32.totalorder %s356_s23, %s356_s23 }
 0x157   :  { %p363_p0 = por %p362_p13, %p361_p12 }
 0x159   :  { %p364_p1 = pnand %p363_p0, %p357_p11 }
 0x15b   :  { %367 = shalt.err (!%p364_p1)
}
 0x15c   :  { %216 = dma.vmem_to_hbm [thread:$0]  %s211_s22, 256, %s527_s6, [#allocation12], %s408_s26, %s408_s26, %s409_s27   ;;  %vm181_vm2 = vcmask 0  }
 0x15d   :  { %s414_s5 = smov [#allocation10]  }
 0x15e   :  { %s189_s28 = sshll.u32 %s414_s5, 4  ;;  %s190_s28 = int_to_ptr.vmem [resolvable:$true] %s189_s28 }
 0x15f   :  { %s376_s30 = scalar_lea.vmem %s190_s28, 16  ;;  %s380_s7 = scalar_lea.vmem %s190_s28, 32 }
 0x160   :  { %p377_p2 = scmp.ne.s32.totalorder %s190_s28, %s376_s30  ;;  %p381_p3 = scmp.lt.s32.totalorder %s190_s28, %s190_s28 }
 0x161   :  { %p382_p4 = scmp.lt.s32.totalorder %s380_s7, %s376_s30 }
 0x163   :  { %p383_p5 = por %p382_p4, %p381_p3 }
 0x165   :  { %p384_p6 = pnand %p383_p5, %p377_p2 }
 0x1d8   :  { %v171_v0 = vpop.xlane.xlu0 %170 }
 0x1d9   :  { %v172_v1 = vrot.slane %v171_v0, 4 }
 0x1db   :  { %v173_v2 = vadd.f32 %v172_v1, %v171_v0 }
 0x1dd   :  { %v174_v3 = vrot.slane %v173_v2, 2 }
 0x1df   :  { %v175_v4 = vadd.f32 %v174_v3, %v173_v2 }
 0x1e1   :  { %v176_v5 = vrot.slane %v175_v4, 1 }
 0x1e3   :  { %v177_v7 = vadd.f32 %v176_v5, %v175_v4 }
 0x1e5   :  { %233 = vpush %v177_v7 }
 0x216   :  { %s234_s29 = spop %233 }
 0x217   :  { %v179_v8 = vstv %s234_s29 }
 0x218   :  { %v180_v29 = vmul.f32 0.00048828125, %v179_v8 }
 0x21a   :  { %182 = vst.msk [vmem:[#allocation10] sm:$0x1] %vm181_vm2, %v180_v29 }
 0x21b   :  { %387 = shalt.err (!%p384_p6)
}
 0x21c   :  { %192 = dma.vmem_to_hbm [thread:$0]  %s190_s28, 16, %s525_s4, [#allocation4]  }
 0x21d   :  { %402 = dma.done.wait [#allocation4], 16  }
 0x21e   :  { %403 = vsyncadd [#allocation4], 4294967280 }
 0x21f   :  { %404 = dma.done.wait [#allocation12], 512  }
 0x220   :  { %405 = vsyncadd [#allocation12], 4294966784 }
 0x221   :  { %226 = vsyncpa [#allocation3], 1 }
 0x222   :  { %227 = vsyncpa [#allocation6], 1 }
 0x223   :  { %228 = vsyncpa [#allocation9], 1 }
 0x224   :  { %229 = vsyncpa [#allocation4], 1 }
 0x225   :  { %230 = vsyncpa [#allocation12], 1 }

</bundles_post_ra>
